<compile_context>
chip_gen: v6e
topology: v6e:2x2x1
jax: 0.10.0
libtpu: 0.0.40
codegen_flags: <defaults>
</compile_context>

<pallas_src>
import jax
import jax.numpy as jnp
from jax.experimental import pallas as pl
from jax.experimental.pallas import tpu as pltpu

LANE = 128  # vreg lane width


def _round_up(n, m):
    return ((n + m - 1) // m) * m


def _pad2(a, rows, cols):
    pr, pc = rows - a.shape[0], cols - a.shape[1]
    if pr == 0 and pc == 0:
        return a
    return jnp.pad(a, ((0, pr), (0, pc)))


def _vmem_capacity_bytes():
    """Physical VMEM of the attached TPU; conservative 64 MiB fallback."""
    try:
        return int(pltpu.get_tpu_info().vmem_capacity_bytes)
    except Exception:
        return 64 * 1024 * 1024


def mlp_kernel(x_ref, w1_ref, b1_ref, w2_ref, b2_ref, w3_ref, b3_ref, o_ref):
    x = x_ref[...]

    # fc1 + ReLU (accumulate in f32 regardless of the streamed dtype).
    h1 = jnp.dot(x, w1_ref[...], preferred_element_type=jnp.float32) + b1_ref[...]
    h1 = jnp.maximum(h1, 0.0)

    # fc2 + ReLU (feed the MXU in the weights' dtype: bf16-native on v5e/v6e/v7x).
    h2 = jnp.dot(h1.astype(w2_ref.dtype), w2_ref[...],
                 preferred_element_type=jnp.float32) + b2_ref[...]
    h2 = jnp.maximum(h2, 0.0)

    # fc3.  Padded class columns already carry a -1e30 bias (folded in on the host,
    # padded w3 columns are zero), so no in-kernel masking is needed before softmax.
    logits = jnp.dot(h2.astype(w3_ref.dtype), w3_ref[...],
                     preferred_element_type=jnp.float32) + b3_ref[...]

    # Numerically-stable softmax over the lane-dense class axis.
    m = jnp.max(logits, axis=-1, keepdims=True)
    e = jnp.exp(logits - m)
    denom = jnp.sum(e, axis=-1, keepdims=True)
    inv = pl.reciprocal(denom, approx=True)  # EUP slot, frees VALU
    o_ref[...] = (e * inv).astype(o_ref.dtype)


def prepare_params(params, *, compute_dtype=jnp.float32, feature_multiple=LANE):
    """Pad / cast the MLP parameters once (cache the result; do NOT redo per call).

    Weights are (in, out); biases are (1, out).  The fc1 contraction dim (input
    feature axis) is intentionally left unpadded.  feature_multiple: 128 by default;
    prefer 256 for >=128-wide hidden/class dims on v6e/v7x (256x256 MXU fill).
    Returns (padded_param_tuple, out_size).
    """
    w1, b1, w2, b2, w3, b3 = params
    d0 = w1.shape[0]
    h1, h2, c = w1.shape[1], w2.shape[1], w3.shape[1]
    h1p = _round_up(h1, feature_multiple)
    h2p = _round_up(h2, feature_multiple)
    cp = _round_up(c, feature_multiple)

    w1p = _pad2(w1, d0, h1p).astype(compute_dtype)
    w2p = _pad2(w2, h1p, h2p).astype(compute_dtype)
    w3p = _pad2(w3, h2p, cp).astype(compute_dtype)
    # Biases stay f32 (tiny; keeps the -1e30 softmax mask exact after the f32 matmul).
    b1p = _pad2(b1, 1, h1p).astype(jnp.float32)
    b2p = _pad2(b2, 1, h2p).astype(jnp.float32)
    b3p = _pad2(b3, 1, cp).astype(jnp.float32)
    if cp != c:
        # Fold the softmax padding mask into the bias: padded w3 columns are exactly
        # zero, so logits there == -1e30 -> exp(.) == 0.
        col = jnp.arange(cp)[None, :]
        b3p = jnp.where(col < c, b3p, jnp.float32(-1e30))

    return (w1p, b1p, w2p, b2p, w3p, b3p), c


def mlp_forward(x, padded_params, out_size, *, tm=None, out_dtype=jnp.float32):
    w1p, b1p, w2p, b2p, w3p, b3p = padded_params
    B, D0 = x.shape
    assert w1p.shape[0] == D0, "x feature dim must match fc1 input dim"
    H1p, H2p, Cp = w1p.shape[1], w2p.shape[1], w3p.shape[1]
    compute_dtype = w1p.dtype
    in_itemsize = jnp.dtype(compute_dtype).itemsize
    out_itemsize = jnp.dtype(out_dtype).itemsize

    # Batch tiling: generation-aware cap (bigger tiles on 128 MiB v5e/v6e, 256 on
    # 64 MiB v7x) and >=2 grid steps whenever the batch allows, so the "parallel"
    # batch axis can shard across v7x's two TensorCores.
    sub = 16 if min(in_itemsize, out_itemsize) < 4 else 8  # packed-sublane-safe rows
    vmem_cap = _vmem_capacity_bytes()
    tm_cap = 1024 if vmem_cap >= 100 * 1024 * 1024 else 256
    if tm is None:
        tm = min(tm_cap, max(sub, _round_up(pl.cdiv(B, 2), sub)))
    Bp = _round_up(B, tm)
    grid = (Bp // tm,)

    # Pad only the batch axis of x (padded rows compute throwaway rows, sliced off
    # below); the feature axis keeps its true width so no extra HBM traffic.
    xp = x if Bp == B else jnp.pad(x, ((0, Bp - B), (0, 0)))
    xp = xp.astype(compute_dtype)

    flops = 2 * Bp * (D0 * H1p + H1p * H2p + H2p * Cp)
    transcendentals = Bp * Cp + Bp  # exp + per-row reciprocal
    bytes_accessed = (
        in_itemsize * (Bp * D0 + D0 * H1p + H1p * H2p + H2p * Cp)
        + 4 * (H1p + H2p + Cp)
        + out_itemsize * Bp * Cp
    )

    # VMEM budget: double-buffered x/out tiles + resident weights/biases + f32
    # activations, with headroom, capped at ~75% of physical VMEM.
    io_bytes = 2 * tm * (D0 * in_itemsize + Cp * out_itemsize)
    w_bytes = (2 * (D0 * H1p + H1p * H2p + H2p * Cp) * in_itemsize
               + 2 * (H1p + H2p + Cp) * 4)
    act_bytes = 2 * tm * (H1p + H2p + 2 * Cp) * 4
    vmem_limit = max(2 * (io_bytes + w_bytes + act_bytes), 16 * 1024 * 1024)
    vmem_limit = min(vmem_limit, (vmem_cap * 3) // 4)

    resident = lambda i: (0, 0)  # weights/biases keep the same block across the grid

    def build(single_buffer_weights):
        w_kw = {}
        if single_buffer_weights:
            # Block index never changes: double-buffering these only wastes VMEM.
            w_kw = dict(pipeline_mode=pl.Buffered(1))
        w_spec = lambda shape: pl.BlockSpec(shape, resident, **w_kw)
        return pl.pallas_call(
            mlp_kernel,
            out_shape=jax.ShapeDtypeStruct((Bp, Cp), out_dtype),
            grid=grid,
            in_specs=[
                pl.BlockSpec((tm, D0), lambda i: (i, 0)),  # streamed x tile
                w_spec((D0, H1p)), w_spec((1, H1p)),
                w_spec((H1p, H2p)), w_spec((1, H2p)),
                w_spec((H2p, Cp)), w_spec((1, Cp)),
            ],
            out_specs=pl.BlockSpec((tm, Cp), lambda i: (i, 0)),  # lane-dense store
            compiler_params=pltpu.CompilerParams(
                dimension_semantics=("parallel",),
                vmem_limit_bytes=int(vmem_limit),
            ),
            cost_estimate=pl.CostEstimate(
                flops=flops,
                transcendentals=transcendentals,
                bytes_accessed=bytes_accessed,
            ),
        )

    args = (xp, w1p, b1p, w2p, b2p, w3p, b3p)
    try:
        out_padded = build(True)(*args)
    except Exception:
        # Installed jax rejects Buffered(1) in_specs -> fall back to default buffering.
        out_padded = build(False)(*args)

    return out_padded[:B, :out_size]


def init_params(key, input_size, hidden_sizes, output_size):
    # Deterministic synthetic initialization (shapes match the nn.Linear layers,
    # stored as (in, out) = W.T).
    k1, k2, k3 = jax.random.split(key, 3)
    dims = [(input_size, hidden_sizes[0]),
            (hidden_sizes[0], hidden_sizes[1]),
            (hidden_sizes[1], output_size)]
    params = []
    for k, (din, dout) in zip((k1, k2, k3), dims):
        kw, kb = jax.random.split(k)
        scale = 1.0 / jnp.sqrt(din)
        w = jax.random.uniform(kw, (din, dout), jnp.float32, -scale, scale)
        b = jax.random.uniform(kb, (1, dout), jnp.float32, -scale, scale)
        params += [w, b]
    return tuple(params)


def mlp_reference(x, params):
    w1, b1, w2, b2, w3, b3 = params
    h1 = jnp.maximum(x @ w1 + b1, 0.0)
    h2 = jnp.maximum(h1 @ w2 + b2, 0.0)
    return jax.nn.softmax(h2 @ w3 + b3, axis=1)


if __name__ == "__main__":
    key = jax.random.PRNGKey(0)
    kx, kp = jax.random.split(key)

    # moon dataset MLP: 2-D points -> class probabilities
    batch, input_size, hidden_sizes, output_size = 8, 2, (32, 32), 2

    x = jax.random.normal(kx, (batch, input_size), jnp.float32)
    params = init_params(kp, input_size, hidden_sizes, output_size)
    ref = mlp_reference(x, params)

    # --- f32 path: strict correctness check against the pure-JAX reference. ---
    padded_f32, n_classes = prepare_params(params, compute_dtype=jnp.float32)
    out = jax.block_until_ready(mlp_forward(x, padded_f32, n_classes))
    assert out.shape == (batch, output_size)
    # approx reciprocal (EUP) -> slightly looser tolerance than exact division
    assert jnp.allclose(jnp.sum(out, axis=1), 1.0, atol=2e-3)
    assert jnp.allclose(out, ref, atol=2e-3, rtol=2e-3), float(jnp.max(jnp.abs(out - ref)))

    # --- bf16 path: production config (bf16 streamed x / resident weights / output,
    # f32 MXU accumulation); looser tolerance for the reduced mantissa. ---
    padded_bf16, _ = prepare_params(params, compute_dtype=jnp.bfloat16)
    out16 = jax.block_until_ready(
        mlp_forward(x, padded_bf16, n_classes, out_dtype=jnp.bfloat16))
    assert out16.shape == (batch, output_size)
    assert jnp.allclose(out16.astype(jnp.float32), ref, atol=3e-2, rtol=3e-2)

    print("KERNEL_OK")
</pallas_src>

<mosaic_0001>
module attributes {stable_mosaic.version = 11 : i64} {
  func.func @mlp_kernel(%arg0: i32, %arg1: memref<8x2xf32, #tpu.memory_space<vmem>>, %arg2: memref<2x128xf32, #tpu.memory_space<vmem>>, %arg3: memref<1x128xf32, #tpu.memory_space<vmem>>, %arg4: memref<128x128xf32, #tpu.memory_space<vmem>>, %arg5: memref<1x128xf32, #tpu.memory_space<vmem>>, %arg6: memref<128x128xf32, #tpu.memory_space<vmem>>, %arg7: memref<1x128xf32, #tpu.memory_space<vmem>>, %arg8: memref<8x128xf32, #tpu.memory_space<vmem>>) attributes {dimension_semantics = [#tpu.dimension_semantics<parallel>], iteration_bounds = array<i64: 1>, scalar_prefetch = 0 : i64, scratch_operands = 0 : i64, tpu.core_type = #tpu.core_type<tc>, window_params = [{transform_indices = @transform_0, window_bounds = array<i64: 8, 2>}, {pipeline_mode = #tpu.pipeline_mode<synchronous>, transform_indices = @transform_1, window_bounds = array<i64: 2, 128>}, {pipeline_mode = #tpu.pipeline_mode<synchronous>, transform_indices = @transform_2, window_bounds = array<i64: 1, 128>}, {pipeline_mode = #tpu.pipeline_mode<synchronous>, transform_indices = @transform_3, window_bounds = array<i64: 128, 128>}, {pipeline_mode = #tpu.pipeline_mode<synchronous>, transform_indices = @transform_4, window_bounds = array<i64: 1, 128>}, {pipeline_mode = #tpu.pipeline_mode<synchronous>, transform_indices = @transform_5, window_bounds = array<i64: 128, 128>}, {pipeline_mode = #tpu.pipeline_mode<synchronous>, transform_indices = @transform_6, window_bounds = array<i64: 1, 128>}, {transform_indices = @transform_7, window_bounds = array<i64: 8, 128>}]} {
    %c0 = arith.constant 0 : index
    %c0_0 = arith.constant 0 : index
    %0 = vector.load %arg1[%c0, %c0_0] : memref<8x2xf32, #tpu.memory_space<vmem>>, vector<8x2xf32>
    %c0_1 = arith.constant 0 : index
    %c0_2 = arith.constant 0 : index
    %1 = vector.load %arg2[%c0_1, %c0_2] : memref<2x128xf32, #tpu.memory_space<vmem>>, vector<2x128xf32>
    %cst = arith.constant dense<0.000000e+00> : vector<8x128xf32>
    %2 = tpu.matmul %0, %1, %cst {dimension_numbers = #tpu.dot_dimension_numbers<[1], [0], [0], [1], [0, 0, 1, 1], [], []>} : vector<8x2xf32>, vector<2x128xf32>, vector<8x128xf32> -> vector<8x128xf32>
    %c0_3 = arith.constant 0 : index
    %c0_4 = arith.constant 0 : index
    %3 = vector.load %arg3[%c0_3, %c0_4] : memref<1x128xf32, #tpu.memory_space<vmem>>, vector<1x128xf32>
    %4 = vector.broadcast %3 : vector<1x128xf32> to vector<8x128xf32>
    %5 = arith.addf %2, %4 : vector<8x128xf32>
    %cst_5 = arith.constant 0.000000e+00 : f32
    %6 = vector.broadcast %cst_5 : f32 to vector<8x128xf32>
    %7 = arith.maximumf %5, %6 : vector<8x128xf32>
    %c0_6 = arith.constant 0 : index
    %c0_7 = arith.constant 0 : index
    %8 = vector.load %arg4[%c0_6, %c0_7] : memref<128x128xf32, #tpu.memory_space<vmem>>, vector<128x128xf32>
    %cst_8 = arith.constant dense<0.000000e+00> : vector<8x128xf32>
    %9 = tpu.matmul %7, %8, %cst_8 {dimension_numbers = #tpu.dot_dimension_numbers<[1], [0], [0], [1], [0, 0, 1, 1], [], []>} : vector<8x128xf32>, vector<128x128xf32>, vector<8x128xf32> -> vector<8x128xf32>
    %c0_9 = arith.constant 0 : index
    %c0_10 = arith.constant 0 : index
    %10 = vector.load %arg5[%c0_9, %c0_10] : memref<1x128xf32, #tpu.memory_space<vmem>>, vector<1x128xf32>
    %11 = vector.broadcast %10 : vector<1x128xf32> to vector<8x128xf32>
    %12 = arith.addf %9, %11 : vector<8x128xf32>
    %cst_11 = arith.constant 0.000000e+00 : f32
    %13 = vector.broadcast %cst_11 : f32 to vector<8x128xf32>
    %14 = arith.maximumf %12, %13 : vector<8x128xf32>
    %c0_12 = arith.constant 0 : index
    %c0_13 = arith.constant 0 : index
    %15 = vector.load %arg6[%c0_12, %c0_13] : memref<128x128xf32, #tpu.memory_space<vmem>>, vector<128x128xf32>
    %cst_14 = arith.constant dense<0.000000e+00> : vector<8x128xf32>
    %16 = tpu.matmul %14, %15, %cst_14 {dimension_numbers = #tpu.dot_dimension_numbers<[1], [0], [0], [1], [0, 0, 1, 1], [], []>} : vector<8x128xf32>, vector<128x128xf32>, vector<8x128xf32> -> vector<8x128xf32>
    %c0_15 = arith.constant 0 : index
    %c0_16 = arith.constant 0 : index
    %17 = vector.load %arg7[%c0_15, %c0_16] : memref<1x128xf32, #tpu.memory_space<vmem>>, vector<1x128xf32>
    %18 = vector.broadcast %17 : vector<1x128xf32> to vector<8x128xf32>
    %19 = arith.addf %16, %18 : vector<8x128xf32>
    %cst_17 = arith.constant dense<0xFF800000> : vector<8xf32>
    %20 = vector.multi_reduction <maximumf>, %19, %cst_17 [1] : vector<8x128xf32> to vector<8xf32>
    %21 = vector.shape_cast %20 : vector<8xf32> to vector<8x1xf32>
    %22 = vector.broadcast %21 : vector<8x1xf32> to vector<8x128xf32>
    %23 = arith.subf %19, %22 : vector<8x128xf32>
    %24 = math.exp %23 : vector<8x128xf32>
    %cst_18 = arith.constant dense<0.000000e+00> : vector<8xf32>
    %25 = vector.multi_reduction <add>, %24, %cst_18 [1] : vector<8x128xf32> to vector<8xf32>
    %26 = vector.shape_cast %25 : vector<8xf32> to vector<8x1xf32>
    %27 = tpu.reciprocal %26 {approx = true} : vector<8x1xf32> -> vector<8x1xf32>
    %28 = vector.broadcast %27 : vector<8x1xf32> to vector<8x128xf32>
    %29 = arith.mulf %24, %28 : vector<8x128xf32>
    %c0_19 = arith.constant 0 : index
    %c0_20 = arith.constant 0 : index
    %30 = vector.load %arg8[%c0_19, %c0_20] : memref<8x128xf32, #tpu.memory_space<vmem>>, vector<8x128xf32>
    tpu.vector_store %arg8[%c0_19, %c0_20], %29 {strides = array<i32>} : memref<8x128xf32, #tpu.memory_space<vmem>>, vector<8x128xf32>,
    return
  }
  func.func @transform_0(%arg0: i32) -> (i32, i32) {
    %c0_i32 = arith.constant 0 : i32
    %c0_i32_0 = arith.constant 0 : i32
    return %arg0, %c0_i32 : i32, i32
  }
  func.func @transform_1(%arg0: i32) -> (i32, i32) {
    %c0_i32 = arith.constant 0 : i32
    %c0_i32_0 = arith.constant 0 : i32
    %c0_i32_1 = arith.constant 0 : i32
    return %c0_i32, %c0_i32_0 : i32, i32
  }
  func.func @transform_2(%arg0: i32) -> (i32, i32) {
    %c0_i32 = arith.constant 0 : i32
    %c0_i32_0 = arith.constant 0 : i32
    %c0_i32_1 = arith.constant 0 : i32
    return %c0_i32, %c0_i32_0 : i32, i32
  }
  func.func @transform_3(%arg0: i32) -> (i32, i32) {
    %c0_i32 = arith.constant 0 : i32
    %c0_i32_0 = arith.constant 0 : i32
    %c0_i32_1 = arith.constant 0 : i32
    return %c0_i32, %c0_i32_0 : i32, i32
  }
  func.func @transform_4(%arg0: i32) -> (i32, i32) {
    %c0_i32 = arith.constant 0 : i32
    %c0_i32_0 = arith.constant 0 : i32
    %c0_i32_1 = arith.constant 0 : i32
    return %c0_i32, %c0_i32_0 : i32, i32
  }
  func.func @transform_5(%arg0: i32) -> (i32, i32) {
    %c0_i32 = arith.constant 0 : i32
    %c0_i32_0 = arith.constant 0 : i32
    %c0_i32_1 = arith.constant 0 : i32
    return %c0_i32, %c0_i32_0 : i32, i32
  }
  func.func @transform_6(%arg0: i32) -> (i32, i32) {
    %c0_i32 = arith.constant 0 : i32
    %c0_i32_0 = arith.constant 0 : i32
    %c0_i32_1 = arith.constant 0 : i32
    return %c0_i32, %c0_i32_0 : i32, i32
  }
  func.func @transform_7(%arg0: i32) -> (i32, i32) {
    %c0_i32 = arith.constant 0 : i32
    %c0_i32_0 = arith.constant 0 : i32
    return %arg0, %c0_i32 : i32, i32
  }
}

module attributes {stable_mosaic.version = 11 : i64} {
  func.func @mlp_kernel(%arg0: i32, %arg1: memref<8x2xf32, #tpu.memory_space<vmem>>, %arg2: memref<2x128xf32, #tpu.memory_space<vmem>>, %arg3: memref<1x128xf32, #tpu.memory_space<vmem>>, %arg4: memref<128x128xf32, #tpu.memory_space<vmem>>, %arg5: memref<1x128xf32, #tpu.memory_space<vmem>>, %arg6: memref<128x128xf32, #tpu.memory_space<vmem>>, %arg7: memref<1x128xf32, #tpu.memory_space<vmem>>, %arg8: memref<8x128xf32, #tpu.memory_space<vmem>>) attributes {dimension_semantics = [#tpu.dimension_semantics<parallel>], iteration_bounds = array<i64: 1>, scalar_prefetch = 0 : i64, scratch_operands = 0 : i64, tpu.core_type = #tpu.core_type<tc>, window_params = [{transform_indices = @transform_0, window_bounds = array<i64: 8, 2>}, {pipeline_mode = #tpu.pipeline_mode<synchronous>, transform_indices = @transform_1, window_bounds = array<i64: 2, 128>}, {pipeline_mode = #tpu.pipeline_mode<synchronous>, transform_indices = @transform_2, window_bounds = array<i64: 1, 128>}, {pipeline_mode = #tpu.pipeline_mode<synchronous>, transform_indices = @transform_3, window_bounds = array<i64: 128, 128>}, {pipeline_mode = #tpu.pipeline_mode<synchronous>, transform_indices = @transform_4, window_bounds = array<i64: 1, 128>}, {pipeline_mode = #tpu.pipeline_mode<synchronous>, transform_indices = @transform_5, window_bounds = array<i64: 128, 128>}, {pipeline_mode = #tpu.pipeline_mode<synchronous>, transform_indices = @transform_6, window_bounds = array<i64: 1, 128>}, {transform_indices = @transform_7, window_bounds = array<i64: 8, 128>}]} {
    %c0 = arith.constant 0 : index
    %c0_0 = arith.constant 0 : index
    %0 = vector.load %arg1[%c0, %c0_0] : memref<8x2xf32, #tpu.memory_space<vmem>>, vector<8x2xf32>
    %c0_1 = arith.constant 0 : index
    %c0_2 = arith.constant 0 : index
    %1 = vector.load %arg2[%c0_1, %c0_2] : memref<2x128xf32, #tpu.memory_space<vmem>>, vector<2x128xf32>
    %cst = arith.constant dense<0.000000e+00> : vector<8x128xf32>
    %2 = tpu.matmul %0, %1, %cst {dimension_numbers = #tpu.dot_dimension_numbers<[1], [0], [0], [1], [0, 0, 1, 1], [], []>} : vector<8x2xf32>, vector<2x128xf32>, vector<8x128xf32> -> vector<8x128xf32>
    %c0_3 = arith.constant 0 : index
    %c0_4 = arith.constant 0 : index
    %3 = vector.load %arg3[%c0_3, %c0_4] : memref<1x128xf32, #tpu.memory_space<vmem>>, vector<1x128xf32>
    %4 = vector.broadcast %3 : vector<1x128xf32> to vector<8x128xf32>
    %5 = arith.addf %2, %4 : vector<8x128xf32>
    %cst_5 = arith.constant 0.000000e+00 : f32
    %6 = vector.broadcast %cst_5 : f32 to vector<8x128xf32>
    %7 = arith.maximumf %5, %6 : vector<8x128xf32>
    %c0_6 = arith.constant 0 : index
    %c0_7 = arith.constant 0 : index
    %8 = vector.load %arg4[%c0_6, %c0_7] : memref<128x128xf32, #tpu.memory_space<vmem>>, vector<128x128xf32>
    %cst_8 = arith.constant dense<0.000000e+00> : vector<8x128xf32>
    %9 = tpu.matmul %7, %8, %cst_8 {dimension_numbers = #tpu.dot_dimension_numbers<[1], [0], [0], [1], [0, 0, 1, 1], [], []>} : vector<8x128xf32>, vector<128x128xf32>, vector<8x128xf32> -> vector<8x128xf32>
    %c0_9 = arith.constant 0 : index
    %c0_10 = arith.constant 0 : index
    %10 = vector.load %arg5[%c0_9, %c0_10] : memref<1x128xf32, #tpu.memory_space<vmem>>, vector<1x128xf32>
    %11 = vector.broadcast %10 : vector<1x128xf32> to vector<8x128xf32>
    %12 = arith.addf %9, %11 : vector<8x128xf32>
    %cst_11 = arith.constant 0.000000e+00 : f32
    %13 = vector.broadcast %cst_11 : f32 to vector<8x128xf32>
    %14 = arith.maximumf %12, %13 : vector<8x128xf32>
    %c0_12 = arith.constant 0 : index
    %c0_13 = arith.constant 0 : index
    %15 = vector.load %arg6[%c0_12, %c0_13] : memref<128x128xf32, #tpu.memory_space<vmem>>, vector<128x128xf32>
    %cst_14 = arith.constant dense<0.000000e+00> : vector<8x128xf32>
    %16 = tpu.matmul %14, %15, %cst_14 {dimension_numbers = #tpu.dot_dimension_numbers<[1], [0], [0], [1], [0, 0, 1, 1], [], []>} : vector<8x128xf32>, vector<128x128xf32>, vector<8x128xf32> -> vector<8x128xf32>
    %c0_15 = arith.constant 0 : index
    %c0_16 = arith.constant 0 : index
    %17 = vector.load %arg7[%c0_15, %c0_16] : memref<1x128xf32, #tpu.memory_space<vmem>>, vector<1x128xf32>
    %18 = vector.broadcast %17 : vector<1x128xf32> to vector<8x128xf32>
    %19 = arith.addf %16, %18 : vector<8x128xf32>
    %cst_17 = arith.constant dense<0xFF800000> : vector<8xf32>
    %20 = vector.multi_reduction <maximumf>, %19, %cst_17 [1] : vector<8x128xf32> to vector<8xf32>
    %21 = vector.shape_cast %20 : vector<8xf32> to vector<8x1xf32>
    %22 = vector.broadcast %21 : vector<8x1xf32> to vector<8x128xf32>
    %23 = arith.subf %19, %22 : vector<8x128xf32>
    %24 = math.exp %23 : vector<8x128xf32>
    %cst_18 = arith.constant dense<0.000000e+00> : vector<8xf32>
    %25 = vector.multi_reduction <add>, %24, %cst_18 [1] : vector<8x128xf32> to vector<8xf32>
    %26 = vector.shape_cast %25 : vector<8xf32> to vector<8x1xf32>
    %27 = tpu.reciprocal %26 {approx = true} : vector<8x1xf32> -> vector<8x1xf32>
    %28 = vector.broadcast %27 : vector<8x1xf32> to vector<8x128xf32>
    %29 = arith.mulf %24, %28 : vector<8x128xf32>
    %c0_19 = arith.constant 0 : index
    %c0_20 = arith.constant 0 : index
    %30 = vector.load %arg8[%c0_19, %c0_20] : memref<8x128xf32, #tpu.memory_space<vmem>>, vector<8x128xf32>
    tpu.vector_store %arg8[%c0_19, %c0_20], %29 {strides = array<i32>} : memref<8x128xf32, #tpu.memory_space<vmem>>, vector<8x128xf32>,
    return
  }
  func.func @transform_0(%arg0: i32) -> (i32, i32) {
    %c0_i32 = arith.constant 0 : i32
    %c0_i32_0 = arith.constant 0 : i32
    return %arg0, %c0_i32 : i32, i32
  }
  func.func @transform_1(%arg0: i32) -> (i32, i32) {
    %c0_i32 = arith.constant 0 : i32
    %c0_i32_0 = arith.constant 0 : i32
    %c0_i32_1 = arith.constant 0 : i32
    return %c0_i32, %c0_i32_0 : i32, i32
  }
  func.func @transform_2(%arg0: i32) -> (i32, i32) {
    %c0_i32 = arith.constant 0 : i32
    %c0_i32_0 = arith.constant 0 : i32
    %c0_i32_1 = arith.constant 0 : i32
    return %c0_i32, %c0_i32_0 : i32, i32
  }
  func.func @transform_3(%arg0: i32) -> (i32, i32) {
    %c0_i32 = arith.constant 0 : i32
    %c0_i32_0 = arith.constant 0 : i32
    %c0_i32_1 = arith.constant 0 : i32
    return %c0_i32, %c0_i32_0 : i32, i32
  }
  func.func @transform_4(%arg0: i32) -> (i32, i32) {
    %c0_i32 = arith.constant 0 : i32
    %c0_i32_0 = arith.constant 0 : i32
    %c0_i32_1 = arith.constant 0 : i32
    return %c0_i32, %c0_i32_0 : i32, i32
  }
  func.func @transform_5(%arg0: i32) -> (i32, i32) {
    %c0_i32 = arith.constant 0 : i32
    %c0_i32_0 = arith.constant 0 : i32
    %c0_i32_1 = arith.constant 0 : i32
    return %c0_i32, %c0_i32_0 : i32, i32
  }
  func.func @transform_6(%arg0: i32) -> (i32, i32) {
    %c0_i32 = arith.constant 0 : i32
    %c0_i32_0 = arith.constant 0 : i32
    %c0_i32_1 = arith.constant 0 : i32
    return %c0_i32, %c0_i32_0 : i32, i32
  }
  func.func @transform_7(%arg0: i32) -> (i32, i32) {
    %c0_i32 = arith.constant 0 : i32
    %c0_i32_0 = arith.constant 0 : i32
    return %arg0, %c0_i32 : i32, i32
  }
}

</mosaic_0001>

<bundles_post_ra>
// kernel: tpu_custom_call.1
= control target key start
LH: loop header
LB: loop body
LE: loop exit
PB: predicated region body
PF: predicated region fallthrough
CT: control target
= control target key end

     0   :  { %12 = vsyncpa [#allocation3], 0  ;;  %s659_s0 = inlined_call_operand.vmem [shape: f32[8,2], index: 0, kind: input, shape index: {}]   ;;  %s660_s1 = inlined_call_operand.vmem [shape: f32[2,128], index: 1, kind: input, shape index: {}]   ;;  %s661_s2 = inlined_call_operand.vmem [shape: f32[1,128], index: 2, kind: input, shape index: {}]   ;;  %s662_s3 = inlined_call_operand.hbm [shape: f32[128,128], index: 3, kind: input, shape index: {}]   ;;  %s663_s4 = inlined_call_operand.vmem [shape: f32[1,128], index: 4, kind: input, shape index: {}]   ;;  %s664_s5 = inlined_call_operand.hbm [shape: f32[128,128], index: 5, kind: input, shape index: {}]   ;;  %s665_s6 = inlined_call_operand.vmem [shape: f32[1,128], index: 6, kind: input, shape index: {}]   ;;  %s666_s7 = inlined_call_operand.hbm [shape: f32[8,128], index: 7, kind: output, shape index: {}]  }
   0x1   :  { %13 = vsyncpa [#allocation6], 0 }
   0x2   :  { %14 = vsyncpa [#allocation4], 0  ;;  %s549_s24 = smov [#allocation2]  }
   0x3   :  { %s26_s25 = sshll.u32 %s549_s24, 4  ;;  %s27_s25 = int_to_ptr.vmem [resolvable:$true] %s26_s25 }
   0x4   :  { %s491_s26 = scalar_lea.vmem %s27_s25, 2048  ;;  %p496_p1 = scmp.lt.s32.totalorder %s27_s25, %s27_s25 }
   0x5   :  { %p492_p0 = scmp.ne.s32.totalorder %s27_s25, %s491_s26  ;;  %p497_p2 = scmp.lt.s32.totalorder %s491_s26, %s491_s26 }
   0x7   :  { %p498_p3 = por %p497_p2, %p496_p1 }
   0x9   :  { %p499_p4 = pnand %p498_p3, %p492_p0 }
   0xb   :  { %502 = shalt.err (!%p499_p4)
}
   0xc   :  { %s550_s27 = smov 128   ;;  %s551_s28 = smov 8  }
   0xd   :  { %32 = dma.hbm_to_vmem [thread:$0]  %s662_s3, 2048, %s27_s25, [#allocation3], %s550_s27, %s550_s27, %s551_s28  }
   0xe   :  { %s552_s8 = smov [#allocation5]  }
   0xf   :  { %s40_s9 = sshll.u32 %s552_s8, 4  ;;  %s41_s9 = int_to_ptr.vmem [resolvable:$true] %s40_s9 }
  0x10   :  { %s511_s10 = scalar_lea.vmem %s41_s9, 2048  ;;  %p516_p6 = scmp.lt.s32.totalorder %s41_s9, %s41_s9 }
  0x11   :  { %p512_p5 = scmp.ne.s32.totalorder %s41_s9, %s511_s10  ;;  %p517_p7 = scmp.lt.s32.totalorder %s511_s10, %s511_s10 }
  0x13   :  { %p518_p8 = por %p517_p7, %p516_p6 }
  0x15   :  { %p519_p9 = pnand %p518_p8, %p512_p5 }
  0x17   :  { %522 = shalt.err (!%p519_p9)
}
  0x18   :  { %46 = dma.hbm_to_vmem [thread:$0]  %s664_s5, 2048, %s41_s9, [#allocation6], %s550_s27, %s550_s27, %s551_s28  }
  0x19   :  { %543 = dma.done.wait [#allocation3], 2048  }
  0x1a   :  { %544 = vsyncadd [#allocation3], 4294965248 }
  0x1b   :  { %545 = dma.done.wait [#allocation6], 2048  }
  0x1c   :  { %546 = vsyncadd [#allocation6], 4294965248  ;;  %v553_v0 = vmov 0.0   ;;  %vm554_vm0 = vmmov 0   ;;  %vm68_vm1 = vcmask 1041408   ;;  %vm64_vm2 = vcmask 15360  }
  0x1d   :  { %397 = vmatprep.subr.mxu0 %v553_v0  ;;  %399 = vmatprep.mubr.msk.f32.mxu0 %vm554_vm0, %v553_v0  ;;  %v56_v1 = vld [vmem:[%s660_s1] sm:$0x3]  ;;  %v158_v3 = vld [vmem:[#allocation2 + $0x78] sm:$0xff]  ;;  %v157_v4 = vld [vmem:[#allocation2 + $0x70] sm:$0xff] }
  0x1e   :  { %402 = vmatprep.subr.mxu1 %v553_v0  ;;  %434 = vmatprep.mubr.msk.f32.mxu1 %vm554_vm0, %v553_v0  ;;  %v55_v2 = vld [vmem:[%s659_s0] sm:$0xff]  ;;  %v156_v5 = vld [vmem:[#allocation2 + $0x68] sm:$0xff]  ;;  %v154_v7 = vld [vmem:[#allocation2 + $0x58] sm:$0xff] }
  0x1f   :  { %398 = vmatpush3.msk.msra.mxu0 %vm68_vm1, %v56_v1  ;;  %403 = vmatpush3.msra.mxu1 %v158_v3  ;;  %v155_v6 = vld [vmem:[#allocation2 + $0x60] sm:$0xff]  ;;  %v153_v8 = vld [vmem:[#allocation2 + $0x50] sm:$0xff]  ;;  %v152_v9 = vld [vmem:[#allocation2 + $0x48] sm:$0xff] }
  0x20   :  { %400 = vmatmul.mubr.msk.f32.vlgmr.msra.gmra.mxu0 %vm64_vm2, %v55_v2  ;;  %404 = vmatprep.subr.mxu1 %v553_v0  ;;  %v151_v10 = vld [vmem:[#allocation2 + $0x40] sm:$0xff]  ;;  %v150_v11 = vld [vmem:[#allocation2 + $0x38] sm:$0xff]  ;;  %v149_v12 = vld [vmem:[#allocation2 + $0x30] sm:$0xff] }
  0x21   :  { %405 = vmatpush3.msra.mxu1 %v157_v4  ;;  %437 = vmatprep.subr.mxu0 %v553_v0  ;;  %v148_v13 = vld [vmem:[#allocation2 + $0x28] sm:$0xff]  ;;  %v147_v14 = vld [vmem:[#allocation2 + $0x20] sm:$0xff]  ;;  %v146_v15 = vld [vmem:[#allocation2 + $0x18] sm:$0xff] }
  0x22   :  { %406 = vmatprep.subr.mxu1 %v553_v0  ;;  %469 = vmatprep.mubr.msk.f32.mxu0 %vm554_vm0, %v553_v0  ;;  %v145_v16 = vld [vmem:[#allocation2 + $0x10] sm:$0xff]  ;;  %v144_v17 = vld [vmem:[#allocation2 + $0x8] sm:$0xff]  ;;  %v143_v18 = vld [vmem:[#allocation2] sm:$0xff] }
  0x23   :  { %407 = vmatpush3.msra.mxu1 %v156_v5  ;;  %v252_v19 = vld [vmem:[#allocation5 + $0x78] sm:$0xff]  ;;  %v251_v20 = vld [vmem:[#allocation5 + $0x70] sm:$0xff]  ;;  %v250_v21 = vld [vmem:[#allocation5 + $0x68] sm:$0xff] }
  0x24   :  { %408 = vmatprep.subr.mxu1 %v553_v0  ;;  %438 = vmatpush3.msra.mxu0 %v252_v19  ;;  %v249_v22 = vld [vmem:[#allocation5 + $0x60] sm:$0xff]  ;;  %v248_v23 = vld [vmem:[#allocation5 + $0x58] sm:$0xff]  ;;  %v247_v24 = vld [vmem:[#allocation5 + $0x50] sm:$0xff] }
  0x25   :  { %409 = vmatpush3.msra.mxu1 %v155_v6  ;;  %439 = vmatprep.subr.mxu0 %v553_v0  ;;  %v246_v25 = vld [vmem:[#allocation5 + $0x48] sm:$0xff]  ;;  %v245_v26 = vld [vmem:[#allocation5 + $0x40] sm:$0xff]  ;;  %v244_v27 = vld [vmem:[#allocation5 + $0x38] sm:$0xff] }
  0x26   :  { %410 = vmatprep.subr.mxu1 %v553_v0  ;;  %440 = vmatpush3.msra.mxu0 %v251_v20  ;;  %v243_v28 = vld [vmem:[#allocation5 + $0x30] sm:$0xff]  ;;  %v242_v29 = vld [vmem:[#allocation5 + $0x28] sm:$0xff]  ;;  %v241_v30 = vld [vmem:[#allocation5 + $0x20] sm:$0xff] }
  0x27   :  { %411 = vmatpush3.msra.mxu1 %v154_v7  ;;  %441 = vmatprep.subr.mxu0 %v553_v0  ;;  %v240_v31 = vld [vmem:[#allocation5 + $0x18] sm:$0xff]  ;;  %v356_v32 = vld [vmem:[%s661_s2] ss:$0 sm:$0xff]  ;;  %v239_v37 = vld [vmem:[#allocation5 + $0x10] sm:$0xff] }
  0x28   :  { %412 = vmatprep.subr.mxu1 %v553_v0  ;;  %442 = vmatpush3.msra.mxu0 %v250_v21  ;;  %v238_v38 = vld [vmem:[#allocation5 + $0x8] sm:$0xff]  ;;  %v237_v39 = vld [vmem:[#allocation5] sm:$0xff] }
  0x29   :  { %413 = vmatpush3.msra.mxu1 %v153_v8  ;;  %443 = vmatprep.subr.mxu0 %v553_v0  ;;  %v359_v40 = vld [vmem:[%s663_s4] ss:$0 sm:$0xff]  ;;  %s555_s4 = smov [#allocation7]  }
  0x2a   :  { %414 = vmatprep.subr.mxu1 %v553_v0  ;;  %444 = vmatpush3.msra.mxu0 %v249_v22  ;;  %v360_v45 = vld [vmem:[%s665_s6] ss:$0 sm:$0xff]  ;;  %s346_s18 = sshll.u32 %s555_s4, 4  ;;  %s347_s18 = int_to_ptr.vmem [resolvable:$true] %s346_s18 }
  0x2b   :  { %415 = vmatpush3.msra.mxu1 %v152_v9  ;;  %445 = vmatprep.subr.mxu0 %v553_v0  ;;  %s523_s19 = scalar_lea.vmem %s347_s18, 128  ;;  %p528_p11 = scmp.lt.s32.totalorder %s347_s18, %s347_s18 }
  0x2c   :  { %416 = vmatprep.subr.mxu1 %v553_v0  ;;  %446 = vmatpush3.msra.mxu0 %v248_v23  ;;  %p524_p10 = scmp.ne.s32.totalorder %s347_s18, %s523_s19  ;;  %p529_p12 = scmp.lt.s32.totalorder %s523_s19, %s523_s19 }
  0x2d   :  { %417 = vmatpush3.msra.mxu1 %v151_v10  ;;  %447 = vmatprep.subr.mxu0 %v553_v0 }
  0x2e   :  { %418 = vmatprep.subr.mxu1 %v553_v0  ;;  %448 = vmatpush3.msra.mxu0 %v247_v24  ;;  %p530_p13 = por %p529_p12, %p528_p11 }
  0x2f   :  { %419 = vmatpush3.msra.mxu1 %v150_v11  ;;  %449 = vmatprep.subr.mxu0 %v553_v0 }
  0x30   :  { %420 = vmatprep.subr.mxu1 %v553_v0  ;;  %450 = vmatpush3.msra.mxu0 %v246_v25  ;;  %p531_p0 = pnand %p530_p13, %p524_p10 }
  0x31   :  { %421 = vmatpush3.msra.mxu1 %v149_v12  ;;  %451 = vmatprep.subr.mxu0 %v553_v0 }
  0x32   :  { %422 = vmatprep.subr.mxu1 %v553_v0  ;;  %452 = vmatpush3.msra.mxu0 %v245_v26 }
  0x33   :  { %423 = vmatpush3.msra.mxu1 %v148_v13  ;;  %453 = vmatprep.subr.mxu0 %v553_v0 }
  0x34   :  { %424 = vmatprep.subr.mxu1 %v553_v0  ;;  %454 = vmatpush3.msra.mxu0 %v244_v27 }
  0x35   :  { %425 = vmatpush3.msra.mxu1 %v147_v14  ;;  %455 = vmatprep.subr.mxu0 %v553_v0 }
  0x36   :  { %426 = vmatprep.subr.mxu1 %v553_v0  ;;  %456 = vmatpush3.msra.mxu0 %v243_v28 }
  0x37   :  { %427 = vmatpush3.msra.mxu1 %v146_v15  ;;  %457 = vmatprep.subr.mxu0 %v553_v0 }
  0x38   :  { %428 = vmatprep.subr.mxu1 %v553_v0  ;;  %458 = vmatpush3.msra.mxu0 %v242_v29 }
  0x39   :  { %429 = vmatpush3.msra.mxu1 %v145_v16  ;;  %459 = vmatprep.subr.mxu0 %v553_v0 }
  0x3a   :  { %430 = vmatprep.subr.mxu1 %v553_v0  ;;  %460 = vmatpush3.msra.mxu0 %v241_v30 }
  0x3b   :  { %431 = vmatpush3.msra.mxu1 %v144_v17  ;;  %461 = vmatprep.subr.mxu0 %v553_v0 }
  0x3c   :  { %432 = vmatprep.subr.mxu1 %v553_v0  ;;  %462 = vmatpush3.msra.mxu0 %v240_v31 }
  0x3d   :  { %433 = vmatpush3.msra.mxu1 %v143_v18  ;;  %463 = vmatprep.subr.mxu0 %v553_v0 }
  0x3e   :  { %464 = vmatpush3.msra.mxu0 %v239_v37 }
  0x3f   :  { %465 = vmatprep.subr.mxu0 %v553_v0 }
  0x40   :  { %466 = vmatpush3.msra.mxu0 %v238_v38 }
  0x41   :  { %467 = vmatprep.subr.mxu0 %v553_v0 }
  0x42   :  { %468 = vmatpush3.msra.mxu0 %v237_v39 }
  0xe0   :  { %v138_v33 = vpop.f32.mrf.mxu0 }
  0xe1   :  { %v139_v34 = vadd.f32 %v356_v32, %v138_v33 }
  0xe2   :  { %v401_v35 = vpop.f32.mrf.mxu0 }
  0xe3   :  { %v142_v36 = vmax.f32 %v139_v34, 0.0 }
  0xe5   :  { %435 = vmatmul.mubr.f32.vlgmr.msra.gmra.mxu1 %v142_v36 }
 0x1a5   :  { %v232_v41 = vpop.f32.mrf.mxu1 }
 0x1a6   :  { %v233_v42 = vadd.f32 %v359_v40, %v232_v41 }
 0x1a7   :  { %v436_v43 = vpop.f32.mrf.mxu1 }
 0x1a8   :  { %v236_v44 = vmax.f32 %v233_v42, 0.0 }
 0x1aa   :  { %470 = vmatmul.mubr.f32.vlgmr.msra.gmra.mxu0 %v236_v44 }
 0x26a   :  { %v326_v46 = vpop.f32.mrf.mxu0 }
 0x26b   :  { %v327_v47 = vadd.f32 %v360_v45, %v326_v46 }
 0x26c   :  { %v471_v48 = vpop.f32.mrf.mxu0 }
 0x26d   :  { %330 = vmax.xlane.f32.xlu0 %v327_v47 }
 0x2f6   :  { %v331_v49 = vpop.xlane.xlu0 %330 }
 0x2f7   :  { %v332_v50 = vsub.f32 %v327_v47, %v331_v49 }
 0x2f9   :  { %v333_v51 = vmul.f32 1.442695, %v332_v50 }
 0x2fb   :  { %479 = vpow2.f32 %v333_v51 }
 0x308   :  { %v480_v52 = vpop.eup %479 }
 0x309   :  { %335 = vadd.xlane.f32.xlu0 %v480_v52 }
 0x392   :  { %v336_v53 = vpop.xlane.xlu0 %335 }
 0x393   :  { %481 = vrcp.f32 %v336_v53 }
 0x3a0   :  { %v482_v54 = vpop.eup %481 }
 0x3a1   :  { %v338_v55 = vmul.f32 %v482_v54, %v480_v52 }
 0x3a3   :  { %339 = vst [vmem:[#allocation7] sm:$0xff] %v338_v55 }
 0x3a4   :  { %534 = shalt.err (!%p531_p0)
}
 0x3a5   :  { %349 = dma.vmem_to_hbm [thread:$0]  %s347_s18, 128, %s666_s7, [#allocation4]  }
 0x3a6   :  { %547 = dma.done.wait [#allocation4], 128  }
 0x3a7   :  { %548 = vsyncadd [#allocation4], 4294967168 }
 0x3a8   :  { %353 = vsyncpa [#allocation3], 1 }
 0x3a9   :  { %354 = vsyncpa [#allocation6], 1 }
 0x3aa   :  { %355 = vsyncpa [#allocation4], 1 }

// kernel: tpu_custom_call.1
= control target key start
LH: loop header
LB: loop body
LE: loop exit
PB: predicated region body
PF: predicated region fallthrough
CT: control target
= control target key end

     0   :  { %12 = vsyncpa [#allocation3], 0  ;;  %s659_s0 = inlined_call_operand.vmem [shape: f32[8,2], index: 0, kind: input, shape index: {}]   ;;  %s660_s1 = inlined_call_operand.vmem [shape: f32[2,128], index: 1, kind: input, shape index: {}]   ;;  %s661_s2 = inlined_call_operand.vmem [shape: f32[1,128], index: 2, kind: input, shape index: {}]   ;;  %s662_s3 = inlined_call_operand.hbm [shape: f32[128,128], index: 3, kind: input, shape index: {}]   ;;  %s663_s4 = inlined_call_operand.vmem [shape: f32[1,128], index: 4, kind: input, shape index: {}]   ;;  %s664_s5 = inlined_call_operand.hbm [shape: f32[128,128], index: 5, kind: input, shape index: {}]   ;;  %s665_s6 = inlined_call_operand.vmem [shape: f32[1,128], index: 6, kind: input, shape index: {}]   ;;  %s666_s7 = inlined_call_operand.hbm [shape: f32[8,128], index: 7, kind: output, shape index: {}]  }
   0x1   :  { %13 = vsyncpa [#allocation6], 0 }
   0x2   :  { %14 = vsyncpa [#allocation4], 0  ;;  %s549_s24 = smov [#allocation2]  }
   0x3   :  { %s26_s25 = sshll.u32 %s549_s24, 4  ;;  %s27_s25 = int_to_ptr.vmem [resolvable:$true] %s26_s25 }
   0x4   :  { %s491_s26 = scalar_lea.vmem %s27_s25, 2048  ;;  %p496_p1 = scmp.lt.s32.totalorder %s27_s25, %s27_s25 }
   0x5   :  { %p492_p0 = scmp.ne.s32.totalorder %s27_s25, %s491_s26  ;;  %p497_p2 = scmp.lt.s32.totalorder %s491_s26, %s491_s26 }
   0x7   :  { %p498_p3 = por %p497_p2, %p496_p1 }
   0x9   :  { %p499_p4 = pnand %p498_p3, %p492_p0 }
   0xb   :  { %502 = shalt.err (!%p499_p4)
}
   0xc   :  { %s550_s27 = smov 128   ;;  %s551_s28 = smov 8  }
   0xd   :  { %32 = dma.hbm_to_vmem [thread:$0]  %s662_s3, 2048, %s27_s25, [#allocation3], %s550_s27, %s550_s27, %s551_s28  }
   0xe   :  { %s552_s8 = smov [#allocation5]  }
   0xf   :  { %s40_s9 = sshll.u32 %s552_s8, 4  ;;  %s41_s9 = int_to_ptr.vmem [resolvable:$true] %s40_s9 }
  0x10   :  { %s511_s10 = scalar_lea.vmem %s41_s9, 2048  ;;  %p516_p6 = scmp.lt.s32.totalorder %s41_s9, %s41_s9 }
  0x11   :  { %p512_p5 = scmp.ne.s32.totalorder %s41_s9, %s511_s10  ;;  %p517_p7 = scmp.lt.s32.totalorder %s511_s10, %s511_s10 }
  0x13   :  { %p518_p8 = por %p517_p7, %p516_p6 }
  0x15   :  { %p519_p9 = pnand %p518_p8, %p512_p5 }
  0x17   :  { %522 = shalt.err (!%p519_p9)
}
  0x18   :  { %46 = dma.hbm_to_vmem [thread:$0]  %s664_s5, 2048, %s41_s9, [#allocation6], %s550_s27, %s550_s27, %s551_s28  }
  0x19   :  { %543 = dma.done.wait [#allocation3], 2048  }
  0x1a   :  { %544 = vsyncadd [#allocation3], 4294965248 }
  0x1b   :  { %545 = dma.done.wait [#allocation6], 2048  }
  0x1c   :  { %546 = vsyncadd [#allocation6], 4294965248  ;;  %v553_v0 = vmov 0.0   ;;  %vm554_vm0 = vmmov 0   ;;  %vm68_vm1 = vcmask 1041408   ;;  %vm64_vm2 = vcmask 15360  }
  0x1d   :  { %397 = vmatprep.subr.mxu0 %v553_v0  ;;  %399 = vmatprep.mubr.msk.f32.mxu0 %vm554_vm0, %v553_v0  ;;  %v56_v1 = vld [vmem:[%s660_s1] sm:$0x3]  ;;  %v158_v3 = vld [vmem:[#allocation2 + $0x78] sm:$0xff]  ;;  %v157_v4 = vld [vmem:[#allocation2 + $0x70] sm:$0xff] }
  0x1e   :  { %402 = vmatprep.subr.mxu1 %v553_v0  ;;  %434 = vmatprep.mubr.msk.f32.mxu1 %vm554_vm0, %v553_v0  ;;  %v55_v2 = vld [vmem:[%s659_s0] sm:$0xff]  ;;  %v156_v5 = vld [vmem:[#allocation2 + $0x68] sm:$0xff]  ;;  %v154_v7 = vld [vmem:[#allocation2 + $0x58] sm:$0xff] }
  0x1f   :  { %398 = vmatpush3.msk.msra.mxu0 %vm68_vm1, %v56_v1  ;;  %403 = vmatpush3.msra.mxu1 %v158_v3  ;;  %v155_v6 = vld [vmem:[#allocation2 + $0x60] sm:$0xff]  ;;  %v153_v8 = vld [vmem:[#allocation2 + $0x50] sm:$0xff]  ;;  %v152_v9 = vld [vmem:[#allocation2 + $0x48] sm:$0xff] }
  0x20   :  { %400 = vmatmul.mubr.msk.f32.vlgmr.msra.gmra.mxu0 %vm64_vm2, %v55_v2  ;;  %404 = vmatprep.subr.mxu1 %v553_v0  ;;  %v151_v10 = vld [vmem:[#allocation2 + $0x40] sm:$0xff]  ;;  %v150_v11 = vld [vmem:[#allocation2 + $0x38] sm:$0xff]  ;;  %v149_v12 = vld [vmem:[#allocation2 + $0x30] sm:$0xff] }
  0x21   :  { %405 = vmatpush3.msra.mxu1 %v157_v4  ;;  %437 = vmatprep.subr.mxu0 %v553_v0  ;;  %v148_v13 = vld [vmem:[#allocation2 + $0x28] sm:$0xff]  ;;  %v147_v14 = vld [vmem:[#allocation2 + $0x20] sm:$0xff]  ;;  %v146_v15 = vld [vmem:[#allocation2 + $0x18] sm:$0xff] }
  0x22   :  { %406 = vmatprep.subr.mxu1 %v553_v0  ;;  %469 = vmatprep.mubr.msk.f32.mxu0 %vm554_vm0, %v553_v0  ;;  %v145_v16 = vld [vmem:[#allocation2 + $0x10] sm:$0xff]  ;;  %v144_v17 = vld [vmem:[#allocation2 + $0x8] sm:$0xff]  ;;  %v143_v18 = vld [vmem:[#allocation2] sm:$0xff] }
  0x23   :  { %407 = vmatpush3.msra.mxu1 %v156_v5  ;;  %v252_v19 = vld [vmem:[#allocation5 + $0x78] sm:$0xff]  ;;  %v251_v20 = vld [vmem:[#allocation5 + $0x70] sm:$0xff]  ;;  %v250_v21 = vld [vmem:[#allocation5 + $0x68] sm:$0xff] }
  0x24   :  { %408 = vmatprep.subr.mxu1 %v553_v0  ;;  %438 = vmatpush3.msra.mxu0 %v252_v19  ;;  %v249_v22 = vld [vmem:[#allocation5 + $0x60] sm:$0xff]  ;;  %v248_v23 = vld [vmem:[#allocation5 + $0x58] sm:$0xff]  ;;  %v247_v24 = vld [vmem:[#allocation5 + $0x50] sm:$0xff] }
  0x25   :  { %409 = vmatpush3.msra.mxu1 %v155_v6  ;;  %439 = vmatprep.subr.mxu0 %v553_v0  ;;  %v246_v25 = vld [vmem:[#allocation5 + $0x48] sm:$0xff]  ;;  %v245_v26 = vld [vmem:[#allocation5 + $0x40] sm:$0xff]  ;;  %v244_v27 = vld [vmem:[#allocation5 + $0x38] sm:$0xff] }
  0x26   :  { %410 = vmatprep.subr.mxu1 %v553_v0  ;;  %440 = vmatpush3.msra.mxu0 %v251_v20  ;;  %v243_v28 = vld [vmem:[#allocation5 + $0x30] sm:$0xff]  ;;  %v242_v29 = vld [vmem:[#allocation5 + $0x28] sm:$0xff]  ;;  %v241_v30 = vld [vmem:[#allocation5 + $0x20] sm:$0xff] }
  0x27   :  { %411 = vmatpush3.msra.mxu1 %v154_v7  ;;  %441 = vmatprep.subr.mxu0 %v553_v0  ;;  %v240_v31 = vld [vmem:[#allocation5 + $0x18] sm:$0xff]  ;;  %v356_v32 = vld [vmem:[%s661_s2] ss:$0 sm:$0xff]  ;;  %v239_v37 = vld [vmem:[#allocation5 + $0x10] sm:$0xff] }
  0x28   :  { %412 = vmatprep.subr.mxu1 %v553_v0  ;;  %442 = vmatpush3.msra.mxu0 %v250_v21  ;;  %v238_v38 = vld [vmem:[#allocation5 + $0x8] sm:$0xff]  ;;  %v237_v39 = vld [vmem:[#allocation5] sm:$0xff] }
  0x29   :  { %413 = vmatpush3.msra.mxu1 %v153_v8  ;;  %443 = vmatprep.subr.mxu0 %v553_v0  ;;  %v359_v40 = vld [vmem:[%s663_s4] ss:$0 sm:$0xff]  ;;  %s555_s4 = smov [#allocation7]  }
  0x2a   :  { %414 = vmatprep.subr.mxu1 %v553_v0  ;;  %444 = vmatpush3.msra.mxu0 %v249_v22  ;;  %v360_v45 = vld [vmem:[%s665_s6] ss:$0 sm:$0xff]  ;;  %s346_s18 = sshll.u32 %s555_s4, 4  ;;  %s347_s18 = int_to_ptr.vmem [resolvable:$true] %s346_s18 }
  0x2b   :  { %415 = vmatpush3.msra.mxu1 %v152_v9  ;;  %445 = vmatprep.subr.mxu0 %v553_v0  ;;  %s523_s19 = scalar_lea.vmem %s347_s18, 128  ;;  %p528_p11 = scmp.lt.s32.totalorder %s347_s18, %s347_s18 }
  0x2c   :  { %416 = vmatprep.subr.mxu1 %v553_v0  ;;  %446 = vmatpush3.msra.mxu0 %v248_v23  ;;  %p524_p10 = scmp.ne.s32.totalorder %s347_s18, %s523_s19  ;;  %p529_p12 = scmp.lt.s32.totalorder %s523_s19, %s523_s19 }
  0x2d   :  { %417 = vmatpush3.msra.mxu1 %v151_v10  ;;  %447 = vmatprep.subr.mxu0 %v553_v0 }
  0x2e   :  { %418 = vmatprep.subr.mxu1 %v553_v0  ;;  %448 = vmatpush3.msra.mxu0 %v247_v24  ;;  %p530_p13 = por %p529_p12, %p528_p11 }
  0x2f   :  { %419 = vmatpush3.msra.mxu1 %v150_v11  ;;  %449 = vmatprep.subr.mxu0 %v553_v0 }
  0x30   :  { %420 = vmatprep.subr.mxu1 %v553_v0  ;;  %450 = vmatpush3.msra.mxu0 %v246_v25  ;;  %p531_p0 = pnand %p530_p13, %p524_p10 }
  0x31   :  { %421 = vmatpush3.msra.mxu1 %v149_v12  ;;  %451 = vmatprep.subr.mxu0 %v553_v0 }
  0x32   :  { %422 = vmatprep.subr.mxu1 %v553_v0  ;;  %452 = vmatpush3.msra.mxu0 %v245_v26 }
  0x33   :  { %423 = vmatpush3.msra.mxu1 %v148_v13  ;;  %453 = vmatprep.subr.mxu0 %v553_v0 }
  0x34   :  { %424 = vmatprep.subr.mxu1 %v553_v0  ;;  %454 = vmatpush3.msra.mxu0 %v244_v27 }
  0x35   :  { %425 = vmatpush3.msra.mxu1 %v147_v14  ;;  %455 = vmatprep.subr.mxu0 %v553_v0 }
  0x36   :  { %426 = vmatprep.subr.mxu1 %v553_v0  ;;  %456 = vmatpush3.msra.mxu0 %v243_v28 }
  0x37   :  { %427 = vmatpush3.msra.mxu1 %v146_v15  ;;  %457 = vmatprep.subr.mxu0 %v553_v0 }
  0x38   :  { %428 = vmatprep.subr.mxu1 %v553_v0  ;;  %458 = vmatpush3.msra.mxu0 %v242_v29 }
  0x39   :  { %429 = vmatpush3.msra.mxu1 %v145_v16  ;;  %459 = vmatprep.subr.mxu0 %v553_v0 }
  0x3a   :  { %430 = vmatprep.subr.mxu1 %v553_v0  ;;  %460 = vmatpush3.msra.mxu0 %v241_v30 }
  0x3b   :  { %431 = vmatpush3.msra.mxu1 %v144_v17  ;;  %461 = vmatprep.subr.mxu0 %v553_v0 }
  0x3c   :  { %432 = vmatprep.subr.mxu1 %v553_v0  ;;  %462 = vmatpush3.msra.mxu0 %v240_v31 }
  0x3d   :  { %433 = vmatpush3.msra.mxu1 %v143_v18  ;;  %463 = vmatprep.subr.mxu0 %v553_v0 }
  0x3e   :  { %464 = vmatpush3.msra.mxu0 %v239_v37 }
  0x3f   :  { %465 = vmatprep.subr.mxu0 %v553_v0 }
  0x40   :  { %466 = vmatpush3.msra.mxu0 %v238_v38 }
  0x41   :  { %467 = vmatprep.subr.mxu0 %v553_v0 }
  0x42   :  { %468 = vmatpush3.msra.mxu0 %v237_v39 }
  0xe0   :  { %v138_v33 = vpop.f32.mrf.mxu0 }
  0xe1   :  { %v139_v34 = vadd.f32 %v356_v32, %v138_v33 }
  0xe2   :  { %v401_v35 = vpop.f32.mrf.mxu0 }
  0xe3   :  { %v142_v36 = vmax.f32 %v139_v34, 0.0 }
  0xe5   :  { %435 = vmatmul.mubr.f32.vlgmr.msra.gmra.mxu1 %v142_v36 }
 0x1a5   :  { %v232_v41 = vpop.f32.mrf.mxu1 }
 0x1a6   :  { %v233_v42 = vadd.f32 %v359_v40, %v232_v41 }
 0x1a7   :  { %v436_v43 = vpop.f32.mrf.mxu1 }
 0x1a8   :  { %v236_v44 = vmax.f32 %v233_v42, 0.0 }
 0x1aa   :  { %470 = vmatmul.mubr.f32.vlgmr.msra.gmra.mxu0 %v236_v44 }
 0x26a   :  { %v326_v46 = vpop.f32.mrf.mxu0 }
 0x26b   :  { %v327_v47 = vadd.f32 %v360_v45, %v326_v46 }
 0x26c   :  { %v471_v48 = vpop.f32.mrf.mxu0 }
 0x26d   :  { %330 = vmax.xlane.f32.xlu0 %v327_v47 }
 0x2f6   :  { %v331_v49 = vpop.xlane.xlu0 %330 }
 0x2f7   :  { %v332_v50 = vsub.f32 %v327_v47, %v331_v49 }
 0x2f9   :  { %v333_v51 = vmul.f32 1.442695, %v332_v50 }
 0x2fb   :  { %479 = vpow2.f32 %v333_v51 }
 0x308   :  { %v480_v52 = vpop.eup %479 }
 0x309   :  { %335 = vadd.xlane.f32.xlu0 %v480_v52 }
 0x392   :  { %v336_v53 = vpop.xlane.xlu0 %335 }
 0x393   :  { %481 = vrcp.f32 %v336_v53 }
 0x3a0   :  { %v482_v54 = vpop.eup %481 }
 0x3a1   :  { %v338_v55 = vmul.f32 %v482_v54, %v480_v52 }
 0x3a3   :  { %339 = vst [vmem:[#allocation7] sm:$0xff] %v338_v55 }
 0x3a4   :  { %534 = shalt.err (!%p531_p0)
}
 0x3a5   :  { %349 = dma.vmem_to_hbm [thread:$0]  %s347_s18, 128, %s666_s7, [#allocation4]  }
 0x3a6   :  { %547 = dma.done.wait [#allocation4], 128  }
 0x3a7   :  { %548 = vsyncadd [#allocation4], 4294967168 }
 0x3a8   :  { %353 = vsyncpa [#allocation3], 1 }
 0x3a9   :  { %354 = vsyncpa [#allocation6], 1 }
 0x3aa   :  { %355 = vsyncpa [#allocation4], 1 }

</bundles_post_ra>
